<compile_context>
chip_gen: v5e
topology: v5e:2x2
jax: 0.10.0
libtpu: 0.0.40
codegen_flags: <defaults>
</compile_context>

<pallas_src>
import functools

import jax
import jax.numpy as jnp
from jax import lax
from jax.experimental import pallas as pl
from jax.experimental.pallas import tpu as pltpu


def _contrastive_tile_kernel(im_ref, s_ref, d1_ref, d2_ref, out_ref, acc_ref, *,
                             margin, batch, block, precision):
    """One (row-tile i, col-tile j) step.

    im_ref: (T, D) normalized image rows of tile i (revisited across j, no DMA)
    s_ref:  (T, D) normalized sentence rows of tile j (streamed)
    d1_ref: (T, 1) f32 diag cos(im[r], s[r]) for rows of tile i
    d2_ref: (1, T) f32 same diagonal for rows of tile j (already lane-major)
    out_ref: (1, 1) SMEM per-row-tile partial loss (written at j == last only)
    acc_ref: (T, T) f32 VMEM accumulator scratch
    """
    i = pl.program_id(0)
    j = pl.program_id(1)
    last = pl.num_programs(1) - 1

    @pl.when(j == 0)
    def _init():
        acc_ref[...] = jnp.zeros_like(acc_ref)

    # Raw MXU matmul in the input dtype; RHS is consumed transposed by the
    # contraction spec (no explicit s.T relayout). f32 accumulation.
    scores = lax.dot_general(
        im_ref[...], s_ref[...], (((1,), (1,)), ((), ())),
        preferred_element_type=jnp.float32,
        precision=precision)                                         # (T, T)

    t = scores + jnp.float32(margin)
    cost = jnp.maximum(t - d1_ref[...], 0.0) + jnp.maximum(t - d2_ref[...], 0.0)

    padded = (batch % block) != 0          # static Python bool

    def _masked_add():
        # Zero the diagonal of the (B,B) problem and any padded rows/columns.
        rows = i * block + lax.broadcasted_iota(jnp.int32, (block, block), 0)
        cols = j * block + lax.broadcasted_iota(jnp.int32, (block, block), 1)
        keep = jnp.logical_and(rows != cols,
                               jnp.logical_and(rows < batch, cols < batch))
        acc_ref[...] += jnp.where(keep, cost, 0.0)

    def _plain_add():
        acc_ref[...] += cost

    if padded:
        needs_mask = jnp.logical_or(i == j, jnp.logical_or(i == last, j == last))
    else:
        needs_mask = (i == j)
    pl.when(needs_mask)(_masked_add)
    pl.when(jnp.logical_not(needs_mask))(_plain_add)

    @pl.when(j == last)
    def _finalize():
        # Single cross-lane reduce per row tile (not per grid step).
        out_ref[0, 0] = jnp.sum(acc_ref[...])


def _vmem_limit_bytes():
    # Generation-dependent budget: ~3/4 of the reported VMEM capacity
    # (~48 MiB on v7x's 64 MiB/TC, ~96 MiB on v5e/v6e's 128 MiB), clamped.
    try:
        cap = pltpu.get_tpu_info().vmem_capacity_bytes
    except Exception:
        cap = 128 * 1024 * 1024
    return int(min(max(cap * 3 // 4, 32 * 1024 * 1024), 110 * 1024 * 1024))


def _pick_tile(batch, embed_dim, itemsize, vmem_limit):
    # Tiles are multiples of 128 (lane width; the (1, T) diag-column block needs
    # a 128-multiple last dim).  Prefer big tiles (arithmetic intensity grows
    # linearly with T), but keep >= 2 row tiles when the batch allows so the
    # "parallel" axis shards across v7x's two TensorCores, and stay inside the
    # VMEM budget: 2 streamed (T, D) specs x 2 buffers + ~4 (T, T) f32 tiles of
    # accumulator / temporaries.
    for t in (512, 384, 256, 128):
        if t != 128 and batch < 2 * t:
            continue
        need = 4 * t * embed_dim * itemsize + 4 * t * t * 4
        if need <= (vmem_limit * 3) // 5:
            return t
    return 128


def contrastive_loss(im, s, margin=0.2, *, block_b=None,
                     precision=lax.Precision.HIGHEST):
    """im, s: (batch, embed_dim). Returns scalar f32 loss (max_violation=False).

    `precision` only affects f32 inputs; bf16 inputs use the native MXU path.
    Lower precision stays correct because the diagonal is masked in-kernel.
    """
    assert im.ndim == 2 and im.shape == s.shape
    B, D = im.shape

    # One O(B*D) pass in the wrapper: L2-normalize (f32 math, same clamp
    # semantics as F.normalize eps=1e-12) and precompute the score diagonal.
    eps_sq = jnp.float32(1e-24)
    imf = im.astype(jnp.float32)
    sf = s.astype(jnp.float32)
    im_n = imf * lax.rsqrt(jnp.maximum(jnp.sum(imf * imf, axis=1, keepdims=True), eps_sq))
    s_n = sf * lax.rsqrt(jnp.maximum(jnp.sum(sf * sf, axis=1, keepdims=True), eps_sq))
    diag = jnp.sum(im_n * s_n, axis=1, keepdims=True)        # (B, 1) f32
    im_n = im_n.astype(im.dtype)
    s_n = s_n.astype(s.dtype)

    vmem_limit = _vmem_limit_bytes()
    if block_b is not None:
        assert block_b % 128 == 0, "block_b must be a multiple of 128"
        T = block_b
    else:
        T = _pick_tile(B, D, jnp.dtype(im_n.dtype).itemsize, vmem_limit)

    # Pad the batch up to a tile multiple; padded rows/cols are masked in-kernel.
    num_t = pl.cdiv(B, T)
    B_pad = num_t * T
    if B_pad != B:
        pad = B_pad - B
        im_n = jnp.pad(im_n, ((0, pad), (0, 0)))
        s_n = jnp.pad(s_n, ((0, pad), (0, 0)))
        diag = jnp.pad(diag, ((0, pad), (0, 0)))
    d_row = diag                       # (B_pad, 1)
    d_col = diag.reshape(1, B_pad)     # (1, B_pad), lane-major — no in-kernel transpose

    # TODO(synk): tile the embed (D) dimension with an inner-K accumulation for
    # very large embed_dim (currently D is a single full-extent block).
    kernel = functools.partial(
        _contrastive_tile_kernel,
        margin=float(margin), batch=B, block=T, precision=precision)

    partials = pl.pallas_call(
        kernel,
        out_shape=jax.ShapeDtypeStruct((num_t, 1), jnp.float32),
        grid=(num_t, num_t),
        in_specs=[
            pl.BlockSpec((T, D), lambda i, j: (i, 0)),    # im rows (tile i)
            pl.BlockSpec((T, D), lambda i, j: (j, 0)),    # s rows (tile j, streamed)
            pl.BlockSpec((T, 1), lambda i, j: (i, 0)),    # diag for rows of tile i
            pl.BlockSpec((1, T), lambda i, j: (0, j)),    # diag for rows of tile j
        ],
        out_specs=pl.BlockSpec((1, 1), lambda i, j: (i, 0),
                               memory_space=pltpu.MemorySpace.SMEM),
        scratch_shapes=[pltpu.VMEM((T, T), jnp.float32)],
        compiler_params=pltpu.CompilerParams(
            dimension_semantics=("parallel", "arbitrary"),
            vmem_limit_bytes=vmem_limit,
        ),
    )(im_n, s_n, d_row, d_col)

    return jnp.sum(partials)


def contrastive_loss_ref(im, s, margin=0.2):
    """Pure-JAX mirror of the PyTorch forward (max_violation=False)."""
    eps = 1e-12
    im_n = im / jnp.maximum(jnp.linalg.norm(im, axis=1, keepdims=True), eps)
    s_n = s / jnp.maximum(jnp.linalg.norm(s, axis=1, keepdims=True), eps)
    scores = jnp.matmul(im_n, s_n.T, precision=lax.Precision.HIGHEST)
    diag = jnp.diagonal(scores)[:, None]
    cost_s = jnp.maximum(margin + scores - diag, 0.0)
    cost_im = jnp.maximum(margin + scores - diag.T, 0.0)
    eye = jnp.eye(scores.shape[0], dtype=bool)
    cost_s = jnp.where(eye, 0.0, cost_s)
    cost_im = jnp.where(eye, 0.0, cost_im)
    return jnp.sum(cost_s) + jnp.sum(cost_im)


# TODO(synk): max_violation=True branch (row/col max hinge instead of sum) is not
# implemented; this kernel reproduces the module default max_violation=False.


if __name__ == "__main__":
    key = jax.random.PRNGKey(0)
    k1, k2, k3, k4 = jax.random.split(key, 4)

    # Case 1: small batch, single padded tile (16 -> 128, grid (1,1)); exercises
    # the diagonal + padding mask path.
    im = jax.random.normal(k1, (16, 32), dtype=jnp.float32)
    s = jax.random.normal(k2, (16, 32), dtype=jnp.float32)
    loss = contrastive_loss(im, s, margin=0.2)
    jax.block_until_ready(loss)
    ref = contrastive_loss_ref(im, s, margin=0.2)
    assert jnp.allclose(loss, ref, rtol=1e-4, atol=1e-3), (loss, ref)

    # Case 2: multi-tile + padding (200 -> 256, grid (2,2)); exercises plain
    # off-diagonal accumulation, masked diagonal/boundary tiles, and the
    # per-row-tile SMEM partials.
    im2 = jax.random.normal(k3, (200, 64), dtype=jnp.float32)
    s2 = jax.random.normal(k4, (200, 64), dtype=jnp.float32)
    loss2 = contrastive_loss(im2, s2, margin=0.2)
    jax.block_until_ready(loss2)
    ref2 = contrastive_loss_ref(im2, s2, margin=0.2)
    assert jnp.allclose(loss2, ref2, rtol=1e-4, atol=1e-3), (loss2, ref2)

    print("KERNEL_OK")
</pallas_src>

<mosaic_0001>
module attributes {stable_mosaic.version = 11 : i64} {
  func.func @_contrastive_tile_kernel(%arg0: i32, %arg1: i32, %arg2: memref<128x32xf32, #tpu.memory_space<vmem>>, %arg3: memref<128x32xf32, #tpu.memory_space<vmem>>, %arg4: memref<128x1xf32, #tpu.memory_space<vmem>>, %arg5: memref<1x128xf32, #tpu.memory_space<vmem>>, %arg6: memref<1x1xf32, #tpu.memory_space<smem>>, %arg7: memref<128x128xf32, #tpu.memory_space<vmem>>) attributes {dimension_semantics = [#tpu.dimension_semantics<parallel>, #tpu.dimension_semantics<arbitrary>], iteration_bounds = array<i64: 1, 1>, scalar_prefetch = 0 : i64, scratch_operands = 1 : i64, tpu.core_type = #tpu.core_type<tc>, window_params = [{transform_indices = @transform_0, window_bounds = array<i64: 128, 32>}, {transform_indices = @transform_1, window_bounds = array<i64: 128, 32>}, {transform_indices = @transform_2, window_bounds = array<i64: 128, 1>}, {transform_indices = @transform_3, window_bounds = array<i64: 1, 128>}, {transform_indices = @transform_4, window_bounds = array<i64: 1, 1>}]} {
    %c0_i32 = arith.constant 0 : i32
    %0 = arith.cmpi eq, %arg1, %c0_i32 : i32
    %1 = arith.extui %0 : i1 to i32
    %c0_i32_0 = arith.constant 0 : i32
    %2 = arith.cmpi ne, %1, %c0_i32_0 : i32
    scf.if %2 {
      %cst_17 = arith.constant 0.000000e+00 : f32
      %32 = vector.broadcast %cst_17 : f32 to vector<128x128xf32>
      %c0_18 = arith.constant 0 : index
      %c0_19 = arith.constant 0 : index
      %33 = vector.load %arg7[%c0_18, %c0_19] : memref<128x128xf32, #tpu.memory_space<vmem>>, vector<128x128xf32>
      tpu.vector_store %arg7[%c0_18, %c0_19], %32 {strides = array<i32>} : memref<128x128xf32, #tpu.memory_space<vmem>>, vector<128x128xf32>,
    } else {
    }
    %c0 = arith.constant 0 : index
    %c0_1 = arith.constant 0 : index
    %3 = vector.load %arg2[%c0, %c0_1] : memref<128x32xf32, #tpu.memory_space<vmem>>, vector<128x32xf32>
    %c0_2 = arith.constant 0 : index
    %c0_3 = arith.constant 0 : index
    %4 = vector.load %arg3[%c0_2, %c0_3] : memref<128x32xf32, #tpu.memory_space<vmem>>, vector<128x32xf32>
    %cst = arith.constant dense<0.000000e+00> : vector<128x128xf32>
    %5 = tpu.matmul %3, %4, %cst {dimension_numbers = #tpu.dot_dimension_numbers<[1], [1], [0], [0], [0, 0, 1, 0], [], []>, precision = #tpu.contract_precision<fp32>} : vector<128x32xf32>, vector<128x32xf32>, vector<128x128xf32> -> vector<128x128xf32>
    %cst_4 = arith.constant 2.000000e-01 : f32
    %6 = vector.broadcast %cst_4 : f32 to vector<128x128xf32>
    %7 = arith.addf %5, %6 : vector<128x128xf32>
    %c0_5 = arith.constant 0 : index
    %c0_6 = arith.constant 0 : index
    %8 = vector.load %arg4[%c0_5, %c0_6] : memref<128x1xf32, #tpu.memory_space<vmem>>, vector<128x1xf32>
    %9 = vector.broadcast %8 : vector<128x1xf32> to vector<128x128xf32>
    %10 = arith.subf %7, %9 : vector<128x128xf32>
    %cst_7 = arith.constant 0.000000e+00 : f32
    %11 = vector.broadcast %cst_7 : f32 to vector<128x128xf32>
    %12 = arith.maximumf %10, %11 : vector<128x128xf32>
    %c0_8 = arith.constant 0 : index
    %c0_9 = arith.constant 0 : index
    %13 = vector.load %arg5[%c0_8, %c0_9] : memref<1x128xf32, #tpu.memory_space<vmem>>, vector<1x128xf32>
    %14 = vector.broadcast %13 : vector<1x128xf32> to vector<128x128xf32>
    %15 = arith.subf %7, %14 : vector<128x128xf32>
    %cst_10 = arith.constant 0.000000e+00 : f32
    %16 = vector.broadcast %cst_10 : f32 to vector<128x128xf32>
    %17 = arith.maximumf %15, %16 : vector<128x128xf32>
    %18 = arith.addf %12, %17 : vector<128x128xf32>
    %19 = arith.cmpi eq, %arg0, %arg1 : i32
    %c0_i32_11 = arith.constant 0 : i32
    %20 = arith.cmpi eq, %arg0, %c0_i32_11 : i32
    %c0_i32_12 = arith.constant 0 : i32
    %21 = arith.cmpi eq, %arg1, %c0_i32_12 : i32
    %22 = arith.ori %20, %21 : i1
    %23 = arith.ori %19, %22 : i1
    %24 = arith.extui %23 : i1 to i32
    %c0_i32_13 = arith.constant 0 : i32
    %25 = arith.cmpi ne, %24, %c0_i32_13 : i32
    scf.if %25 {
      %c128_i32 = arith.constant 128 : i32
      %32 = arith.muli %arg0, %c128_i32 : i32
      %33 = tpu.iota {dimensions = array<i32: 0>} : vector<128x128xi32>
      %34 = vector.broadcast %32 : i32 to vector<128x128xi32>
      %35 = arith.addi %34, %33 : vector<128x128xi32>
      %c128_i32_17 = arith.constant 128 : i32
      %36 = arith.muli %arg1, %c128_i32_17 : i32
      %37 = tpu.iota {dimensions = array<i32: 1>} : vector<128x128xi32>
      %38 = vector.broadcast %36 : i32 to vector<128x128xi32>
      %39 = arith.addi %38, %37 : vector<128x128xi32>
      %40 = arith.cmpi ne, %35, %39 : vector<128x128xi32>
      %c16_i32 = arith.constant 16 : i32
      %41 = vector.broadcast %c16_i32 : i32 to vector<128x128xi32>
      %42 = arith.cmpi slt, %35, %41 : vector<128x128xi32>
      %c16_i32_18 = arith.constant 16 : i32
      %43 = vector.broadcast %c16_i32_18 : i32 to vector<128x128xi32>
      %44 = arith.cmpi slt, %39, %43 : vector<128x128xi32>
      %45 = arith.andi %42, %44 : vector<128x128xi1>
      %46 = arith.andi %40, %45 : vector<128x128xi1>
      %c0_19 = arith.constant 0 : index
      %c0_20 = arith.constant 0 : index
      %47 = vector.load %arg7[%c0_19, %c0_20] : memref<128x128xf32, #tpu.memory_space<vmem>>, vector<128x128xf32>
      %cst_21 = arith.constant 0.000000e+00 : f32
      %48 = vector.broadcast %cst_21 : f32 to vector<128x128xf32>
      %49 = arith.select %46, %18, %48 : vector<128x128xi1>, vector<128x128xf32>
      %50 = arith.addf %47, %49 : vector<128x128xf32>
      %c0_22 = arith.constant 0 : index
      %c0_23 = arith.constant 0 : index
      %51 = vector.load %arg7[%c0_22, %c0_23] : memref<128x128xf32, #tpu.memory_space<vmem>>, vector<128x128xf32>
      tpu.vector_store %arg7[%c0_22, %c0_23], %50 {strides = array<i32>} : memref<128x128xf32, #tpu.memory_space<vmem>>, vector<128x128xf32>,
    } else {
    }
    %true = arith.constant true
    %26 = arith.xori %23, %true : i1
    %27 = arith.extui %26 : i1 to i32
    %c0_i32_14 = arith.constant 0 : i32
    %28 = arith.cmpi ne, %27, %c0_i32_14 : i32
    scf.if %28 {
      %c0_17 = arith.constant 0 : index
      %c0_18 = arith.constant 0 : index
      %32 = vector.load %arg7[%c0_17, %c0_18] : memref<128x128xf32, #tpu.memory_space<vmem>>, vector<128x128xf32>
      %33 = arith.addf %32, %18 : vector<128x128xf32>
      %c0_19 = arith.constant 0 : index
      %c0_20 = arith.constant 0 : index
      %34 = vector.load %arg7[%c0_19, %c0_20] : memref<128x128xf32, #tpu.memory_space<vmem>>, vector<128x128xf32>
      tpu.vector_store %arg7[%c0_19, %c0_20], %33 {strides = array<i32>} : memref<128x128xf32, #tpu.memory_space<vmem>>, vector<128x128xf32>,
    } else {
    }
    %c0_i32_15 = arith.constant 0 : i32
    %29 = arith.cmpi eq, %arg1, %c0_i32_15 : i32
    %30 = arith.extui %29 : i1 to i32
    %c0_i32_16 = arith.constant 0 : i32
    %31 = arith.cmpi ne, %30, %c0_i32_16 : i32
    scf.if %31 {
      %c0_17 = arith.constant 0 : index
      %c0_18 = arith.constant 0 : index
      %32 = vector.load %arg7[%c0_17, %c0_18] : memref<128x128xf32, #tpu.memory_space<vmem>>, vector<128x128xf32>
      %33 = vector.shape_cast %32 : vector<128x128xf32> to vector<1x128x128xf32>
      %cst_19 = arith.constant dense<0.000000e+00> : vector<1xf32>
      %34 = vector.multi_reduction <add>, %33, %cst_19 [1, 2] : vector<1x128x128xf32> to vector<1xf32>
      %35 = vector.shape_cast %34 : vector<1xf32> to vector<1x1x1xf32>
      %36 = vector.extract %35[0, 0, 0] : f32 from vector<1x1x1xf32>
      %c0_20 = arith.constant 0 : index
      %c0_21 = arith.constant 0 : index
      %37 = memref.load %arg6[%c0_20, %c0_21] : memref<1x1xf32, #tpu.memory_space<smem>>
      memref.store %36, %arg6[%c0_20, %c0_21] : memref<1x1xf32, #tpu.memory_space<smem>>
    } else {
    }
    return
  }
  func.func @transform_0(%arg0: i32, %arg1: i32) -> (i32, i32) {
    %c0_i32 = arith.constant 0 : i32
    %c0_i32_0 = arith.constant 0 : i32
    return %arg0, %c0_i32 : i32, i32
  }
  func.func @transform_1(%arg0: i32, %arg1: i32) -> (i32, i32) {
    %c0_i32 = arith.constant 0 : i32
    %c0_i32_0 = arith.constant 0 : i32
    return %arg1, %c0_i32 : i32, i32
  }
  func.func @transform_2(%arg0: i32, %arg1: i32) -> (i32, i32) {
    %c0_i32 = arith.constant 0 : i32
    %c0_i32_0 = arith.constant 0 : i32
    return %arg0, %c0_i32 : i32, i32
  }
  func.func @transform_3(%arg0: i32, %arg1: i32) -> (i32, i32) {
    %c0_i32 = arith.constant 0 : i32
    %c0_i32_0 = arith.constant 0 : i32
    return %c0_i32, %arg1 : i32, i32
  }
  func.func @transform_4(%arg0: i32, %arg1: i32) -> (i32, i32) {
    %c0_i32 = arith.constant 0 : i32
    %c0_i32_0 = arith.constant 0 : i32
    return %arg0, %c0_i32 : i32, i32
  }
}

</mosaic_0001>

<bundles_post_ra>
// kernel: tpu_custom_call.1
= control target key start
LH: loop header
LB: loop body
LE: loop exit
PB: predicated region body
PF: predicated region fallthrough
CT: control target
= control target key end

     0   :  { %vm70_vm0 = vcmask 261120   ;;  %s2161_s0 = inlined_call_operand.vmem [shape: f32[128,32], index: 0, kind: input, shape index: {}]   ;;  %s2162_s1 = inlined_call_operand.vmem [shape: f32[128,32], index: 1, kind: input, shape index: {}]   ;;  %s2163_s2 = inlined_call_operand.vmem [shape: f32[128,1], index: 2, kind: input, shape index: {}]   ;;  %s2164_s3 = inlined_call_operand.vmem [shape: f32[1,128], index: 3, kind: input, shape index: {}]   ;;  %s2165_s4 = inlined_call_operand.hbm [shape: f32[1,1], index: 4, kind: output, shape index: {}]  }
   0x1   :  { %v69_v0 = vld [vmem:[%s2162_s1 + $0x78] sm:$0xff]  ;;  %v68_v1 = vld [vmem:[%s2162_s1 + $0x70] sm:$0xff]  ;;  %v67_v2 = vld [vmem:[%s2162_s1 + $0x68] sm:$0xff] }
   0x2   :  { %v165_v3 = vsel %vm70_vm0, %v69_v0, 0  ;;  %v162_v4 = vsel %vm70_vm0, %v68_v1, 0  ;;  %v159_v5 = vsel %vm70_vm0, %v67_v2, 0  ;;  %v66_v6 = vld [vmem:[%s2162_s1 + $0x60] sm:$0xff]  ;;  %v65_v7 = vld [vmem:[%s2162_s1 + $0x58] sm:$0xff]  ;;  %v64_v17 = vld [vmem:[%s2162_s1 + $0x50] sm:$0xff] }
   0x3   :  { %v1537_v8 = vand.u32 4294901760, %v165_v3  ;;  %v1539_v9 = vand.u32 4294901760, %v162_v4  ;;  %v1541_v10 = vand.u32 4294901760, %v159_v5  ;;  %v156_v11 = vsel %vm70_vm0, %v66_v6, 0 }
   0x4   :  { %v1544_v12 = vand.u32 4294901760, %v156_v11  ;;  %v153_v15 = vsel %vm70_vm0, %v65_v7, 0 }
   0x5   :  { %1440 = vmatpush.xpose.msra.mxu2 %v1537_v8  ;;  %v1548_v13 = vsub.f32 %v165_v3, %v1537_v8  ;;  %v1551_v14 = vsub.f32 %v162_v4, %v1539_v9  ;;  %168 = vmatpush.xpose.msra.mxu0 %v1537_v8  ;;  %v1556_v16 = vsub.f32 %v159_v5, %v1541_v10 }
   0x6   :  { %9 = vsyncpa [#allocation4], 0  ;;  %v1563_v20 = vand.u32 4294901760, %v153_v15  ;;  %v150_v21 = vsel %vm70_vm0, %v64_v17, 0  ;;  %v1576_v25 = vsub.f32 %v156_v11, %v1544_v12  ;;  %v63_v26 = vld [vmem:[%s2162_s1 + $0x48] sm:$0xff]  ;;  %v62_v34 = vld [vmem:[%s2162_s1 + $0x40] sm:$0xff] }
   0x7   :  { %v330_v18 = vand.u32 4294901760, %v1548_v13  ;;  %v336_v19 = vand.u32 4294901760, %v1551_v14  ;;  %v342_v24 = vand.u32 4294901760, %v1556_v16  ;;  %v1581_v28 = vand.u32 4294901760, %v150_v21  ;;  %v61_v41 = vld [vmem:[%s2162_s1 + $0x38] sm:$0xff]  ;;  %v60_v48 = vld [vmem:[%s2162_s1 + $0x30] sm:$0xff] }
   0x8   :  { %v147_v29 = vsel %vm70_vm0, %v63_v26, 0  ;;  %v348_v32 = vand.u32 4294901760, %v1576_v25  ;;  %v1590_v33 = vsub.f32 %v153_v15, %v1563_v20  ;;  %v144_v40 = vsel %vm70_vm0, %v62_v34, 0  ;;  %v59_v55 = vld [vmem:[%s2162_s1 + $0x28] sm:$0xff]  ;;  %v58_v62 = vld [vmem:[%s2162_s1 + $0x20] sm:$0xff]  ;;  %v57_v5 = vld [vmem:[%s2162_s1 + $0x18] sm:$0xff] }
   0x9   :  { %1441 = vmatpush.xpose.msra.mxu2 %v1539_v9  ;;  %v331_v22 = vsub.f32 %v1548_v13, %v330_v18  ;;  %v337_v23 = vsub.f32 %v1551_v14, %v336_v19  ;;  %170 = vmatpush.xpose.msra.mxu0 %v1539_v9  ;;  %v343_v31 = vsub.f32 %v1556_v16, %v342_v24  ;;  %v1596_v35 = vand.u32 4294901760, %v147_v29  ;;  %v46_v34 = vld [vmem:[%s2161_s0 + $0x40] sm:$0xff]  ;;  %s1430_s30 = sshll.u32 %s2165_s4, 4  ;;  %s1493_s6 = smov [#allocation3]   ;;  %s1431_s30 = int_to_ptr.hbm [resolvable:$true] %s1430_s30 }
   0xa   :  { %v1599_v36 = vsub.f32 %v150_v21, %v1581_v28  ;;  %v349_v38 = vsub.f32 %v1576_v25, %v348_v32  ;;  %v354_v39 = vand.u32 4294901760, %v1590_v33  ;;  %v1611_v42 = vand.u32 4294901760, %v144_v40 }
   0xb   :  { %v332_v27 = vand.u32 4294901760, %v331_v22  ;;  %v338_v30 = vand.u32 4294901760, %v337_v23  ;;  %v344_v37 = vand.u32 4294901760, %v343_v31  ;;  %v141_v46 = vsel %vm70_vm0, %v61_v41, 0  ;;  %v56_v22 = vld [vmem:[%s2162_s1 + $0x10] sm:$0xff] }
   0xc   :  { %v360_v43 = vand.u32 4294901760, %v1599_v36  ;;  %v350_v44 = vand.u32 4294901760, %v349_v38  ;;  %v355_v45 = vsub.f32 %v1590_v33, %v354_v39  ;;  %v1620_v47 = vsub.f32 %v147_v29, %v1596_v35 }
   0xd   :  { %1442 = vmatpush.xpose.msra.mxu2 %v1541_v10  ;;  %1456 = vmatpush.xpose.msra.mxu3 %v332_v27  ;;  %v1629_v50 = vand.u32 4294901760, %v141_v46  ;;  %v138_v53 = vsel %vm70_vm0, %v60_v48, 0  ;;  %v1635_v54 = vsub.f32 %v144_v40, %v1611_v42  ;;  %v135_v57 = vsel %vm70_vm0, %v59_v55, 0  ;;  %v38_v48 = vld [vmem:[%s2161_s0] sm:$0xff] }
   0xe   :  { %333 = vmatpush.xpose.msra.mxu1 %v332_v27  ;;  %172 = vmatpush.xpose.msra.mxu0 %v1541_v10  ;;  %v361_v49 = vsub.f32 %v1599_v36, %v360_v43  ;;  %v356_v51 = vand.u32 4294901760, %v355_v45  ;;  %v366_v52 = vand.u32 4294901760, %v1620_v47  ;;  %v1641_v56 = vand.u32 4294901760, %v138_v53 }
   0xf   :  { %v372_v60 = vand.u32 4294901760, %v1635_v54  ;;  %v1650_v61 = vsub.f32 %v141_v46, %v1629_v50  ;;  %v1656_v63 = vand.u32 4294901760, %v135_v57  ;;  %v132_v0 = vsel %vm70_vm0, %v58_v62, 0 }
  0x10   :  { %v362_v58 = vand.u32 4294901760, %v361_v49  ;;  %v367_v59 = vsub.f32 %v1620_v47, %v366_v52  ;;  %v1665_v4 = vsub.f32 %v138_v53, %v1641_v56  ;;  %v1671_v6 = vand.u32 4294901760, %v132_v0 }
  0x11   :  { %1443 = vmatpush.xpose.msra.mxu2 %v1544_v12  ;;  %1457 = vmatpush.xpose.msra.mxu3 %v338_v30  ;;  %v373_v2 = vsub.f32 %v1635_v54, %v372_v60  ;;  %v2175_v3 = vand.u32 4294901760, %v1650_v61  ;;  %v1674_v7 = vsub.f32 %v135_v57, %v1656_v63  ;;  %v129_v21 = vsel %vm70_vm0, %v57_v5, 0 }
  0x12   :  { %339 = vmatpush.xpose.msra.mxu1 %v338_v30  ;;  %174 = vmatpush.xpose.msra.mxu0 %v1544_v12  ;;  %v368_v1 = vand.u32 4294901760, %v367_v59  ;;  %v2172_v17 = vand.u32 4294901760, %v1665_v4  ;;  %v1686_v23 = vand.u32 4294901760, %v129_v21  ;;  %v1689_v26 = vsub.f32 %v132_v0, %v1671_v6 }
  0x13   :  { %v374_v11 = vand.u32 4294901760, %v373_v2  ;;  %v379_v15 = vsub.f32 %v1650_v61, %v2175_v3  ;;  %v2171_v30 = vand.u32 4294901760, %v1674_v7  ;;  %v126_v31 = vsel %vm70_vm0, %v56_v22, 0  ;;  %v47_v2 = vld [vmem:[%s2161_s0 + $0x48] sm:$0xff] }
  0x14   :  { %v385_v29 = vsub.f32 %v1665_v4, %v2172_v17  ;;  %v2168_v38 = vand.u32 4294901760, %v1689_v26  ;;  %v1706_v40 = vsub.f32 %v129_v21, %v1686_v23  ;;  %v1712_v45 = vand.u32 4294901760, %v126_v31 }
  0x15   :  { %1444 = vmatpush.xpose.msra.mxu2 %v1563_v20  ;;  %1458 = vmatpush.xpose.msra.mxu3 %v344_v37  ;;  %v380_v27 = vand.u32 4294901760, %v379_v15  ;;  %v96_v46 = vsel %vm70_vm0, %v46_v34, 0  ;;  %v39_v34 = vld [vmem:[%s2161_s0 + $0x8] sm:$0xff] }
  0x16   :  { %345 = vmatpush.xpose.msra.mxu1 %v344_v37  ;;  %176 = vmatpush.xpose.msra.mxu0 %v1563_v20  ;;  %v55_v37 = vld [vmem:[%s2162_s1 + $0x8] sm:$0xff]  ;;  %v386_v41 = vand.u32 4294901760, %v385_v29  ;;  %v397_v53 = vsub.f32 %v1689_v26, %v2168_v38  ;;  %v2167_v55 = vand.u32 4294901760, %v1706_v40  ;;  %v1727_v57 = vand.u32 4294901760, %v96_v46  ;;  %v40_v38 = vld [vmem:[%s2161_s0 + $0x10] sm:$0xff] }
  0x17   :  { %v123_v49 = vsel %vm70_vm0, %v55_v37, 0  ;;  %v1734_v0 = vsub.f32 %v126_v31, %v1712_v45  ;;  %v99_v31 = vsel %vm70_vm0, %v47_v2, 0 }
  0x18   :  { %v1731_v62 = vand.u32 4294901760, %v123_v49  ;;  %v403_v15 = vsub.f32 %v1706_v40, %v2167_v55  ;;  %v1747_v21 = vsub.f32 %v96_v46, %v1727_v57  ;;  %v75_v46 = vsel %vm70_vm0, %v39_v34, 0 }
  0x19   :  { %1445 = vmatpush.xpose.msra.mxu2 %v1581_v28  ;;  %1459 = vmatpush.xpose.msra.mxu3 %v350_v44  ;;  %v1781_v2 = vand.u32 4294901760, %v75_v46 }
  0x1a   :  { %351 = vmatpush.xpose.msra.mxu1 %v350_v44  ;;  %178 = vmatpush.xpose.msra.mxu0 %v1581_v28  ;;  %v391_v44 = vsub.f32 %v1674_v7, %v2171_v30  ;;  %v1754_v29 = vsub.f32 %v123_v49, %v1731_v62 }
  0x1c   :  { %v392_v59 = vand.u32 4294901760, %v391_v44  ;;  %v1765_v44 = vand.u32 4294901760, %v99_v31 }
  0x1d   :  { %1446 = vmatpush.xpose.msra.mxu2 %v1596_v35  ;;  %1460 = vmatpush.xpose.msra.mxu3 %v356_v51 }
  0x1e   :  { %357 = vmatpush.xpose.msra.mxu1 %v356_v51  ;;  %180 = vmatpush.xpose.msra.mxu0 %v1596_v35  ;;  %v54_v51 = vld [vmem:[%s2162_s1] sm:$0xff]  ;;  %v1787_v34 = vsub.f32 %v99_v31, %v1765_v44 }
  0x21   :  { %1447 = vmatpush.xpose.msra.mxu2 %v1611_v42  ;;  %1461 = vmatpush.xpose.msra.mxu3 %v362_v58 }
  0x22   :  { %363 = vmatpush.xpose.msra.mxu1 %v362_v58  ;;  %182 = vmatpush.xpose.msra.mxu0 %v1611_v42  ;;  %v72_v58 = vsel %vm70_vm0, %v38_v48, 0  ;;  %v404_v48 = vand.u32 4294901760, %v403_v15 }
  0x23   :  { %v1741_v5 = vand.u32 4294901760, %v72_v58 }
  0x25   :  { %1448 = vmatpush.xpose.msra.mxu2 %v1629_v50  ;;  %1462 = vmatpush.xpose.msra.mxu3 %v368_v1  ;;  %v1762_v37 = vsub.f32 %v72_v58, %v1741_v5  ;;  %v48_v58 = vld [vmem:[%s2161_s0 + $0x50] sm:$0xff] }
  0x26   :  { %369 = vmatpush.xpose.msra.mxu1 %v368_v1  ;;  %184 = vmatpush.xpose.msra.mxu0 %v1629_v50  ;;  %v120_v1 = vsel %vm70_vm0, %v54_v51, 0  ;;  %v2170_v51 = vand.u32 4294901760, %v1754_v29  ;;  %v102_v55 = vsel %vm70_vm0, %v48_v58, 0  ;;  %v78_v58 = vsel %vm70_vm0, %v40_v38, 0 }
  0x27   :  { %v1750_v22 = vand.u32 4294901760, %v120_v1  ;;  %v1806_v30 = vand.u32 4294901760, %v102_v55 }
  0x29   :  { %1449 = vmatpush.xpose.msra.mxu2 %v1641_v56  ;;  %1463 = vmatpush.xpose.msra.mxu3 %v374_v11 }
  0x2a   :  { %375 = vmatpush.xpose.msra.mxu1 %v374_v11  ;;  %186 = vmatpush.xpose.msra.mxu0 %v1641_v56  ;;  %v398_v11 = vand.u32 4294901760, %v397_v53  ;;  %v1774_v53 = vsub.f32 %v120_v1, %v1750_v22 }
  0x2d   :  { %1450 = vmatpush.xpose.msra.mxu2 %v1656_v63  ;;  %1464 = vmatpush.xpose.msra.mxu3 %v380_v27 }
  0x2e   :  { %381 = vmatpush.xpose.msra.mxu1 %v380_v27  ;;  %188 = vmatpush.xpose.msra.mxu0 %v1656_v63  ;;  %v2166_v27 = vand.u32 4294901760, %v1734_v0 }
  0x30   :  { %v409_v49 = vsub.f32 %v1734_v0, %v2166_v27  ;;  %v2174_v27 = vand.u32 4294901760, %v1774_v53 }
  0x31   :  { %1451 = vmatpush.xpose.msra.mxu2 %v1671_v6  ;;  %1465 = vmatpush.xpose.msra.mxu3 %v386_v41 }
  0x32   :  { %387 = vmatpush.xpose.msra.mxu1 %v386_v41  ;;  %190 = vmatpush.xpose.msra.mxu0 %v1671_v6  ;;  %v2169_v41 = vand.u32 4294901760, %v1747_v21  ;;  %v410_v1 = vand.u32 4294901760, %v409_v49  ;;  %v1803_v49 = vsub.f32 %v75_v46, %v1781_v2  ;;  %v421_v17 = vsub.f32 %v1774_v53, %v2174_v27  ;;  %v49_v46 = vld [vmem:[%s2161_s0 + $0x58] sm:$0xff] }
  0x33   :  { %v1825_v27 = vsub.f32 %v102_v55, %v1806_v30  ;;  %v105_v3 = vsel %vm70_vm0, %v49_v46, 0 }
  0x34   :  { %v266_v15 = vsub.f32 %v1747_v21, %v2169_v41  ;;  %v209_v38 = vand.u32 4294901760, %v1803_v49 }
  0x35   :  { %1452 = vmatpush.xpose.msra.mxu2 %v1686_v23  ;;  %1466 = vmatpush.xpose.msra.mxu3 %v392_v59 }
  0x36   :  { %393 = vmatpush.xpose.msra.mxu1 %v392_v59  ;;  %192 = vmatpush.xpose.msra.mxu0 %v1686_v23  ;;  %v2173_v59 = vand.u32 4294901760, %v1762_v37  ;;  %v267_v41 = vand.u32 4294901760, %v266_v15  ;;  %v210_v55 = vsub.f32 %v1803_v49, %v209_v38 }
  0x38   :  { %v202_v31 = vsub.f32 %v1762_v37, %v2173_v59  ;;  %v1819_v59 = vand.u32 4294901760, %v78_v58 }
  0x39   :  { %1453 = vmatpush.xpose.msra.mxu2 %v1712_v45  ;;  %1467 = vmatpush.xpose.msra.mxu3 %v398_v11 }
  0x3a   :  { %399 = vmatpush.xpose.msra.mxu1 %v398_v11  ;;  %194 = vmatpush.xpose.msra.mxu0 %v1712_v45  ;;  %v415_v11 = vsub.f32 %v1754_v29, %v2170_v51  ;;  %v273_v51 = vand.u32 4294901760, %v1787_v34  ;;  %v203_v15 = vand.u32 4294901760, %v202_v31  ;;  %v41_v31 = vld [vmem:[%s2161_s0 + $0x18] sm:$0xff] }
  0x3b   :  { %v81_v46 = vsel %vm70_vm0, %v41_v31, 0  ;;  %v42_v31 = vld [vmem:[%s2161_s0 + $0x20] sm:$0xff] }
  0x3d   :  { %1454 = vmatpush.xpose.msra.mxu2 %v1731_v62  ;;  %1468 = vmatpush.xpose.msra.mxu3 %v404_v48 }
  0x3e   :  { %405 = vmatpush.xpose.msra.mxu1 %v404_v48  ;;  %196 = vmatpush.xpose.msra.mxu0 %v1731_v62  ;;  %v416_v48 = vand.u32 4294901760, %v415_v11  ;;  %v274_v11 = vsub.f32 %v1787_v34, %v273_v51 }
  0x41   :  { %1455 = vmatpush.xpose.msra.mxu2 %v1750_v22  ;;  %1469 = vmatpush.xpose.msra.mxu3 %v410_v1 }
  0x42   :  { %411 = vmatpush.xpose.msra.mxu1 %v410_v1  ;;  %198 = vmatpush.xpose.msra.mxu0 %v1750_v22  ;;  %v422_v1 = vand.u32 4294901760, %v421_v17  ;;  %v1843_v17 = vand.u32 4294901760, %v105_v3 }
  0x44   :  { %268 = vmatmul.f32.vlgmr.msra.gmra.mxu2 %v267_v41  ;;  %v1838_v41 = vsub.f32 %v78_v58, %v1819_v59  ;;  %v50_v58 = vld [vmem:[%s2161_s0 + $0x60] sm:$0xff] }
  0x45   :  { %491 = vmatpush.xpose.msrb.mxu2 %v1548_v13  ;;  %1470 = vmatpush.xpose.msra.mxu3 %v416_v48  ;;  %v275_v13 = vand.u32 4294901760, %v274_v11  ;;  %v1852_v11 = vand.u32 4294901760, %v81_v46 }
  0x46   :  { %750 = vmatpush.xpose.msrb.mxu0 %v330_v18  ;;  %417 = vmatpush.xpose.msra.mxu1 %v416_v48  ;;  %v281_v18 = vand.u32 4294901760, %v1825_v27  ;;  %v211_v48 = vand.u32 4294901760, %v210_v55 }
  0x47   :  { %204 = vmatmul.f32.vlgmr.msra.gmra.mxu0 %v203_v15  ;;  %v217_v15 = vand.u32 4294901760, %v1838_v41 }
  0x49   :  { %494 = vmatpush.xpose.msrb.mxu2 %v1551_v14  ;;  %1471 = vmatpush.xpose.msra.mxu3 %v422_v1  ;;  %v282_v14 = vsub.f32 %v1825_v27, %v281_v18 }
  0x4a   :  { %754 = vmatpush.xpose.msrb.mxu0 %v336_v19  ;;  %423 = vmatpush.xpose.msra.mxu1 %v422_v1  ;;  %v1859_v19 = vsub.f32 %v105_v3, %v1843_v17  ;;  %v108_v1 = vsel %vm70_vm0, %v50_v58, 0 }
  0x4b   :  { %v1878_v55 = vand.u32 4294901760, %v108_v1 }
  0x4c   :  { %276 = vmatmul.f32.gmra.mxu2 %v275_v13  ;;  %457 = vmatmul.f32.vlgmr.msra.gmra.mxu3 %v1727_v57  ;;  %v289_v3 = vand.u32 4294901760, %v1859_v19  ;;  %v84_v13 = vsel %vm70_vm0, %v42_v31, 0  ;;  %v43_v31 = vld [vmem:[%s2161_s0 + $0x28] sm:$0xff] }
  0x4d   :  { %619 = vmatpush.xpose.msrb.mxu3 %v1537_v8  ;;  %497 = vmatpush.xpose.msrb.mxu2 %v1556_v16  ;;  %v1875_v16 = vsub.f32 %v81_v46, %v1852_v11  ;;  %v51_v46 = vld [vmem:[%s2161_s0 + $0x68] sm:$0xff] }
  0x4e   :  { %877 = vmatpush.xpose.msrb.mxu1 %v1537_v8  ;;  %758 = vmatpush.xpose.msrb.mxu0 %v342_v24  ;;  %v218_v8 = vsub.f32 %v1838_v41, %v217_v15  ;;  %v283_v24 = vand.u32 4294901760, %v282_v14  ;;  %v1890_v14 = vand.u32 4294901760, %v84_v13 }
  0x4f   :  { %425 = vmatmul.f32.vlgmr.msra.gmra.mxu1 %v1741_v5  ;;  %212 = vmatmul.f32.gmra.mxu0 %v211_v48  ;;  %v225_v48 = vand.u32 4294901760, %v1875_v16 }
  0x50   :  { %v219_v58 = vand.u32 4294901760, %v218_v8 }
  0x51   :  { %621 = vmatpush.xpose.msrb.mxu3 %v1539_v9  ;;  %500 = vmatpush.xpose.msrb.mxu2 %v1576_v25  ;;  %v1897_v25 = vsub.f32 %v108_v1, %v1878_v55 }
  0x52   :  { %879 = vmatpush.xpose.msrb.mxu1 %v1539_v9  ;;  %762 = vmatpush.xpose.msrb.mxu0 %v348_v32  ;;  %v290_v9 = vsub.f32 %v1859_v19, %v289_v3  ;;  %v111_v32 = vsel %vm70_vm0, %v51_v46, 0 }
  0x53   :  { %v2177_v1 = vand.u32 4294901760, %v1897_v25  ;;  %v1916_v8 = vand.u32 4294901760, %v111_v32 }
  0x54   :  { %284 = vmatmul.f32.gmra.mxu2 %v283_v24  ;;  %461 = vmatmul.f32.gmra.mxu3 %v1765_v44  ;;  %v87_v24 = vsel %vm70_vm0, %v43_v31, 0  ;;  %v44_v31 = vld [vmem:[%s2161_s0 + $0x30] sm:$0xff] }
  0x55   :  { %623 = vmatpush.xpose.msrb.mxu3 %v1541_v10  ;;  %503 = vmatpush.xpose.msrb.mxu2 %v1590_v33  ;;  %v1913_v33 = vsub.f32 %v84_v13, %v1890_v14  ;;  %v52_v13 = vld [vmem:[%s2161_s0 + $0x70] sm:$0xff] }
  0x56   :  { %881 = vmatpush.xpose.msrb.mxu1 %v1541_v10  ;;  %766 = vmatpush.xpose.msrb.mxu0 %v354_v39  ;;  %v226_v10 = vsub.f32 %v1875_v16, %v225_v48  ;;  %v291_v39 = vand.u32 4294901760, %v290_v9  ;;  %v1928_v9 = vand.u32 4294901760, %v87_v24 }
  0x57   :  { %429 = vmatmul.f32.gmra.mxu1 %v1781_v2  ;;  %220 = vmatmul.f32.gmra.mxu0 %v219_v58  ;;  %v233_v58 = vand.u32 4294901760, %v1913_v33 }
  0x58   :  { %v227_v46 = vand.u32 4294901760, %v226_v10 }
  0x59   :  { %625 = vmatpush.xpose.msrb.mxu3 %v1544_v12  ;;  %506 = vmatpush.xpose.msrb.mxu2 %v1599_v36  ;;  %v1935_v36 = vsub.f32 %v111_v32, %v1916_v8 }
  0x5a   :  { %883 = vmatpush.xpose.msrb.mxu1 %v1544_v12  ;;  %770 = vmatpush.xpose.msrb.mxu0 %v360_v43  ;;  %v298_v12 = vsub.f32 %v1897_v25, %v2177_v1  ;;  %v114_v43 = vsel %vm70_vm0, %v52_v13, 0 }
  0x5b   :  { %v2176_v32 = vand.u32 4294901760, %v1935_v36  ;;  %v1954_v10 = vand.u32 4294901760, %v114_v43 }
  0x5c   :  { %292 = vmatmul.f32.gmra.mxu2 %v291_v39  ;;  %465 = vmatmul.f32.gmra.mxu3 %v1806_v30  ;;  %v90_v39 = vsel %vm70_vm0, %v44_v31, 0 }
  0x5d   :  { %627 = vmatpush.xpose.msrb.mxu3 %v1563_v20  ;;  %509 = vmatpush.xpose.msrb.mxu2 %v1620_v47  ;;  %v1951_v47 = vsub.f32 %v87_v24, %v1928_v9  ;;  %v53_v24 = vld [vmem:[%s2161_s0 + $0x78] sm:$0xff] }
  0x5e   :  { %885 = vmatpush.xpose.msrb.mxu1 %v1563_v20  ;;  %774 = vmatpush.xpose.msrb.mxu0 %v366_v52  ;;  %v234_v20 = vsub.f32 %v1913_v33, %v233_v58  ;;  %v299_v52 = vand.u32 4294901760, %v298_v12  ;;  %v1966_v12 = vand.u32 4294901760, %v90_v39  ;;  %v117_v31 = vsel %vm70_vm0, %v53_v24, 0 }
  0x5f   :  { %433 = vmatmul.f32.gmra.mxu1 %v1819_v59  ;;  %228 = vmatmul.f32.gmra.mxu0 %v227_v46  ;;  %v241_v46 = vand.u32 4294901760, %v1951_v47  ;;  %v1992_v24 = vand.u32 4294901760, %v117_v31 }
  0x60   :  { %v235_v13 = vand.u32 4294901760, %v234_v20  ;;  %v45_v20 = vld [vmem:[%s2161_s0 + $0x38] sm:$0xff] }
  0x61   :  { %629 = vmatpush.xpose.msrb.mxu3 %v1581_v28  ;;  %512 = vmatpush.xpose.msrb.mxu2 %v1635_v54  ;;  %v1973_v54 = vsub.f32 %v114_v43, %v1954_v10 }
  0x62   :  { %887 = vmatpush.xpose.msrb.mxu1 %v1581_v28  ;;  %778 = vmatpush.xpose.msrb.mxu0 %v372_v60  ;;  %v306_v28 = vsub.f32 %v1935_v36, %v2176_v32  ;;  %v2178_v60 = vand.u32 4294901760, %v1650_v61  ;;  %v2179_v32 = vand.u32 4294901760, %v1665_v4 }
  0x64   :  { %300 = vmatmul.f32.gmra.mxu2 %v299_v52  ;;  %469 = vmatmul.f32.gmra.mxu3 %v1843_v17  ;;  %v307_v43 = vand.u32 4294901760, %v306_v28  ;;  %v313_v52 = vand.u32 4294901760, %v1973_v54 }
  0x65   :  { %631 = vmatpush.xpose.msrb.mxu3 %v1596_v35  ;;  %515 = vmatpush.xpose.msrb.mxu2 %v1650_v61  ;;  %v1989_v61 = vsub.f32 %v90_v39, %v1966_v12 }
  0x66   :  { %889 = vmatpush.xpose.msrb.mxu1 %v1596_v35  ;;  %782 = vmatpush.xpose.msrb.mxu0 %v2178_v60  ;;  %v242_v35 = vsub.f32 %v1951_v47, %v241_v46  ;;  %v93_v60 = vsel %vm70_vm0, %v45_v20, 0  ;;  %v314_v28 = vsub.f32 %v1973_v54, %v313_v52 }
  0x67   :  { %437 = vmatmul.f32.gmra.mxu1 %v1852_v11  ;;  %236 = vmatmul.f32.gmra.mxu0 %v235_v13  ;;  %v249_v39 = vand.u32 4294901760, %v1989_v61  ;;  %v2001_v1 = vand.u32 4294901760, %v93_v60 }
  0x68   :  { %v243_v13 = vand.u32 4294901760, %v242_v35 }
  0x69   :  { %633 = vmatpush.xpose.msrb.mxu3 %v1611_v42  ;;  %518 = vmatpush.xpose.msrb.mxu2 %v1665_v4  ;;  %v2180_v4 = vand.u32 4294901760, %v1674_v7  ;;  %v2020_v20 = vsub.f32 %v93_v60, %v2001_v1 }
  0x6a   :  { %891 = vmatpush.xpose.msrb.mxu1 %v1611_v42  ;;  %786 = vmatpush.xpose.msrb.mxu0 %v2179_v32  ;;  %v2008_v42 = vsub.f32 %v117_v31, %v1992_v24  ;;  %v250_v32 = vsub.f32 %v1989_v61, %v249_v39  ;;  %v315_v31 = vand.u32 4294901760, %v314_v28  ;;  %v1492_v28 = vmov 0  }
  0x6b   :  { %1476 = vset.pattern.permute.xlu0 %v1492_v28 }
  0x6c   :  { %308 = vmatmul.f32.gmra.mxu2 %v307_v43  ;;  %473 = vmatmul.f32.gmra.mxu3 %v1878_v55  ;;  %v251_v35 = vand.u32 4294901760, %v250_v32  ;;  %v257_v43 = vand.u32 4294901760, %v2020_v20  ;;  %v2184_v32 = vand.u32 4294901760, %v1754_v29 }
  0x6d   :  { %635 = vmatpush.xpose.msrb.mxu3 %v1629_v50  ;;  %521 = vmatpush.xpose.msrb.mxu2 %v1674_v7  ;;  %v2181_v7 = vand.u32 4294901760, %v1689_v26 }
  0x6e   :  { %893 = vmatpush.xpose.msrb.mxu1 %v1629_v50  ;;  %790 = vmatpush.xpose.msrb.mxu0 %v2180_v4  ;;  %v321_v50 = vand.u32 4294901760, %v2008_v42 }
  0x6f   :  { %441 = vmatmul.f32.gmra.mxu1 %v1890_v14  ;;  %244 = vmatmul.f32.gmra.mxu0 %v243_v13 }
  0x70   :  { %v322_v60 = vsub.f32 %v2008_v42, %v321_v50 }
  0x71   :  { %637 = vmatpush.xpose.msrb.mxu3 %v1641_v56  ;;  %524 = vmatpush.xpose.msrb.mxu2 %v1689_v26  ;;  %v258_v26 = vsub.f32 %v2020_v20, %v257_v43 }
  0x72   :  { %895 = vmatpush.xpose.msrb.mxu1 %v1641_v56  ;;  %794 = vmatpush.xpose.msrb.mxu0 %v2181_v7  ;;  %v2182_v56 = vand.u32 4294901760, %v1706_v40  ;;  %v323_v13 = vand.u32 4294901760, %v322_v60 }
  0x73   :  { %v259_v4 = vand.u32 4294901760, %v258_v26 }
  0x74   :  { %316 = vmatmul.f32.gmra.mxu2 %v315_v31  ;;  %477 = vmatmul.f32.gmra.mxu3 %v1916_v8 }
  0x75   :  { %639 = vmatpush.xpose.msrb.mxu3 %v1656_v63  ;;  %527 = vmatpush.xpose.msrb.mxu2 %v1706_v40  ;;  %v2183_v40 = vand.u32 4294901760, %v1734_v0 }
  0x76   :  { %897 = vmatpush.xpose.msrb.mxu1 %v1656_v63  ;;  %798 = vmatpush.xpose.msrb.mxu0 %v2182_v56  ;;  %v973_v63 = vld [vmem:[%s2163_s2] sm:$0xff]  ;;  %v1161_v56 = vlaneseq }
  0x77   :  { %445 = vmatmul.f32.gmra.mxu1 %v1928_v9  ;;  %252 = vmatmul.f32.gmra.mxu0 %v251_v35 }
  0x78   :  { %991 = vperm.xlu0 %1476, %v973_v63  }
  0x79   :  { %641 = vmatpush.xpose.msrb.mxu3 %v1671_v6  ;;  %530 = vmatpush.xpose.msrb.mxu2 %v1734_v0  ;;  %v2185_v0 = vand.u32 4294901760, %v1774_v53 }
  0x7a   :  { %899 = vmatpush.xpose.msrb.mxu1 %v1671_v6  ;;  %802 = vmatpush.xpose.msrb.mxu0 %v2183_v40  ;;  %v974_v6 = vld [vmem:[%s2163_s2 + $0x8] sm:$0xff] }
  0x7c   :  { %324 = vmatmul.f32.gmra.mxu2 %v323_v13  ;;  %481 = vmatmul.f32.gmra.mxu3 %v1954_v10 }
  0x7d   :  { %643 = vmatpush.xpose.msrb.mxu3 %v1686_v23  ;;  %533 = vmatpush.xpose.msrb.mxu2 %v1754_v29 }
  0x7e   :  { %901 = vmatpush.xpose.msrb.mxu1 %v1686_v23  ;;  %806 = vmatpush.xpose.msrb.mxu0 %v2184_v32  ;;  %v2186_v23 = vand.u32 4294901760, %v1762_v37  ;;  %v1162_v32 = vshrl.u32 %v1161_v56, 7 }
  0x7f   :  { %449 = vmatmul.f32.gmra.mxu1 %v1966_v12  ;;  %260 = vmatmul.f32.gmra.mxu0 %v259_v4 }
  0x80   :  { %996 = vperm.xlu0 %1476, %v974_v6   ;;  %v1197_v6 = vand.u32 127, %v1161_v56 }
  0x81   :  { %645 = vmatpush.xpose.msrb.mxu3 %v1712_v45  ;;  %536 = vmatpush.xpose.msrb.mxu2 %v1774_v53 }
  0x82   :  { %903 = vmatpush.xpose.msrb.mxu1 %v1712_v45  ;;  %810 = vmatpush.xpose.msrb.mxu0 %v2185_v0  ;;  %vm1200_vm1 = vcmp.ne.s32.totalorder %v1162_v32, %v1197_v6  ;;  %vm1232_vm2 = vcmp.lt.s32.totalorder %v1197_v6, 16 }
  0x83   :  { %vm1249_vm4 = vmand %vm1200_vm1, %vm1232_vm2 }
  0x84   :  { %485 = vmatmul.f32.gmra.mxu3 %v1992_v24  ;;  %539 = vmatmul.f32.vlgmr.msrb.gmra.mxu2 %v1762_v37  ;;  %v2187_v37 = vand.u32 4294901760, %v1747_v21 }
  0x85   :  { %647 = vmatpush.xpose.msrb.mxu3 %v1731_v62 }
  0x86   :  { %905 = vmatpush.xpose.msrb.mxu1 %v1731_v62 }
  0x87   :  { %453 = vmatmul.f32.gmra.mxu1 %v2001_v1  ;;  %812 = vmatmul.f32.vlgmr.msrb.gmra.mxu0 %v1741_v5 }
  0x89   :  { %649 = vmatpush.xpose.msrb.mxu3 %v1750_v22 }
  0x8a   :  { %907 = vmatpush.xpose.msrb.mxu1 %v1750_v22 }
  0x8c   :  { %544 = vmatmul.f32.gmra.mxu2 %v1803_v49  ;;  %653 = vmatmul.f32.vlgmr.msrb.gmra.mxu3 %v2186_v23  ;;  %v1163_v23 = vadd.s32 8, %v1162_v32 }
  0x8e   :  { %vm1201_vm3 = vcmp.ne.s32.totalorder %v1163_v23, %v1197_v6 }
  0x8f   :  { %909 = vmatmul.f32.vlgmr.msrb.gmra.mxu1 %v1741_v5  ;;  %816 = vmatmul.f32.gmra.mxu0 %v1781_v2  ;;  %vm1250_vm5 = vmand %vm1201_vm3, %vm1232_vm2 }
  0x94   :  { %659 = vmatmul.f32.gmra.mxu3 %v209_v38  ;;  %549 = vmatmul.f32.gmra.mxu2 %v1838_v41 }
  0x97   :  { %913 = vmatmul.f32.gmra.mxu1 %v1781_v2  ;;  %820 = vmatmul.f32.gmra.mxu0 %v1819_v59 }
  0x9c   :  { %665 = vmatmul.f32.gmra.mxu3 %v217_v15  ;;  %554 = vmatmul.f32.gmra.mxu2 %v1875_v16 }
  0x9f   :  { %917 = vmatmul.f32.gmra.mxu1 %v1819_v59  ;;  %824 = vmatmul.f32.gmra.mxu0 %v1852_v11 }
  0xa4   :  { %671 = vmatmul.f32.gmra.mxu3 %v225_v48  ;;  %559 = vmatmul.f32.gmra.mxu2 %v1913_v33 }
  0xa7   :  { %921 = vmatmul.f32.gmra.mxu1 %v1852_v11  ;;  %828 = vmatmul.f32.gmra.mxu0 %v1890_v14 }
  0xac   :  { %677 = vmatmul.f32.gmra.mxu3 %v233_v58  ;;  %564 = vmatmul.f32.gmra.mxu2 %v1951_v47 }
  0xaf   :  { %925 = vmatmul.f32.gmra.mxu1 %v1890_v14  ;;  %832 = vmatmul.f32.gmra.mxu0 %v1928_v9  ;;  %v2188_v14 = vand.u32 4294901760, %v1897_v25 }
  0xb4   :  { %683 = vmatmul.f32.gmra.mxu3 %v241_v46  ;;  %569 = vmatmul.f32.gmra.mxu2 %v1989_v61 }
  0xb7   :  { %929 = vmatmul.f32.gmra.mxu1 %v1928_v9  ;;  %836 = vmatmul.f32.gmra.mxu0 %v1966_v12 }
  0xbc   :  { %689 = vmatmul.f32.gmra.mxu3 %v249_v39  ;;  %574 = vmatmul.f32.gmra.mxu2 %v2020_v20 }
  0xbf   :  { %933 = vmatmul.f32.gmra.mxu1 %v1966_v12  ;;  %840 = vmatmul.f32.gmra.mxu0 %v2001_v1 }
  0xc4   :  { %v205_v45 = vpop.f32.mrf.mxu0  ;;  %695 = vmatmul.f32.gmra.mxu3 %v257_v43  ;;  %579 = vmatmul.f32.gmra.mxu2 %v1747_v21 }
  0xc5   :  { %v206_v5 = vadd.f32 0.2, %v205_v45 }
  0xc7   :  { %v269_v62 = vpop.f32.mrf.mxu2  ;;  %937 = vmatmul.f32.gmra.mxu1 %v2001_v1  ;;  %844 = vmatmul.f32.gmra.mxu0 %v1727_v57  ;;  %v2189_v1 = vand.u32 4294901760, %v1935_v36 }
  0xcc   :  { %v426_v22 = vpop.f32.mrf.mxu1  ;;  %v2111_v29 = vpop.f32.mrf.mxu0  ;;  %701 = vmatmul.f32.gmra.mxu3 %v2187_v37  ;;  %584 = vmatmul.f32.gmra.mxu2 %v1787_v34 }
  0xcd   :  { %v427_v53 = vadd.f32 %v426_v22, %v206_v5  ;;  %v214_v31 = vadd.f32 0.2, %v2111_v29 }
  0xcf   :  { %v277_v59 = vpop.f32.mrf.mxu2  ;;  %v458_v2 = vpop.f32.mrf.mxu3  ;;  %941 = vmatmul.f32.gmra.mxu1 %v1727_v57  ;;  %848 = vmatmul.f32.gmra.mxu0 %v1765_v44 }
  0xd4   :  { %v2118_v49 = vpop.f32.mrf.mxu1  ;;  %v221_v38 = vpop.f32.mrf.mxu0  ;;  %707 = vmatmul.f32.gmra.mxu3 %v273_v51  ;;  %589 = vmatmul.f32.gmra.mxu2 %v1825_v27 }
  0xd5   :  { %v431_v43 = vadd.f32 %v2118_v49, %v214_v31 }
  0xd7   :  { %v285_v41 = vpop.f32.mrf.mxu2  ;;  %v462_v21 = vpop.f32.mrf.mxu3  ;;  %945 = vmatmul.f32.gmra.mxu1 %v1765_v44  ;;  %852 = vmatmul.f32.gmra.mxu0 %v1806_v30 }
  0xdc   :  { %v434_v15 = vpop.f32.mrf.mxu1  ;;  %v229_v11 = vpop.f32.mrf.mxu0  ;;  %713 = vmatmul.f32.gmra.mxu3 %v281_v18  ;;  %594 = vmatmul.f32.gmra.mxu2 %v1859_v19 }
  0xdf   :  { %v293_v57 = vpop.f32.mrf.mxu2  ;;  %v466_v16 = vpop.f32.mrf.mxu3  ;;  %949 = vmatmul.f32.gmra.mxu1 %v1806_v30  ;;  %856 = vmatmul.f32.gmra.mxu0 %v1843_v17 }
  0xe4   :  { %v438_v51 = vpop.f32.mrf.mxu1  ;;  %v237_v34 = vpop.f32.mrf.mxu0  ;;  %719 = vmatmul.f32.gmra.mxu3 %v289_v3  ;;  %599 = vmatmul.f32.gmra.mxu2 %v1897_v25 }
  0xe7   :  { %v301_v44 = vpop.f32.mrf.mxu2  ;;  %v470_v48 = vpop.f32.mrf.mxu3  ;;  %953 = vmatmul.f32.gmra.mxu1 %v1843_v17  ;;  %860 = vmatmul.f32.gmra.mxu0 %v1878_v55 }
  0xea   :  { %v992_v35 = vpop.permute.xlu0 %991 }
  0xec   :  { %v442_v27 = vpop.f32.mrf.mxu1  ;;  %v245_v18 = vpop.f32.mrf.mxu0  ;;  %725 = vmatmul.f32.gmra.mxu3 %v2188_v14  ;;  %604 = vmatmul.f32.gmra.mxu2 %v1935_v36 }
  0xef   :  { %v309_v30 = vpop.f32.mrf.mxu2  ;;  %v474_v33 = vpop.f32.mrf.mxu3  ;;  %957 = vmatmul.f32.gmra.mxu1 %v1878_v55  ;;  %864 = vmatmul.f32.gmra.mxu0 %v1916_v8 }
  0xf2   :  { %v997_v37 = vpop.permute.xlu0 %996 }
  0xf4   :  { %v446_v19 = vpop.f32.mrf.mxu1  ;;  %v253_v3 = vpop.f32.mrf.mxu0  ;;  %731 = vmatmul.f32.gmra.mxu3 %v2189_v1  ;;  %609 = vmatmul.f32.gmra.mxu2 %v1973_v54 }
  0xf7   :  { %v317_v17 = vpop.f32.mrf.mxu2  ;;  %v478_v58 = vpop.f32.mrf.mxu3  ;;  %961 = vmatmul.f32.gmra.mxu1 %v1916_v8  ;;  %868 = vmatmul.f32.gmra.mxu0 %v1954_v10 }
  0xfc   :  { %v450_v25 = vpop.f32.mrf.mxu1  ;;  %v261_v9 = vpop.f32.mrf.mxu0  ;;  %737 = vmatmul.f32.gmra.mxu3 %v313_v52  ;;  %614 = vmatmul.f32.gmra.mxu2 %v2008_v42  ;;  %v1477_v42 = vld [vmem:[%s2164_s3] ss:$0 sm:$0xff] }
  0xff   :  { %v325_v55 = vpop.f32.mrf.mxu2  ;;  %v482_v47 = vpop.f32.mrf.mxu3  ;;  %965 = vmatmul.f32.gmra.mxu1 %v1954_v10  ;;  %872 = vmatmul.f32.gmra.mxu0 %v1992_v24 }
 0x104   :  { %v454_v36 = vpop.f32.mrf.mxu1  ;;  %v813_v46 = vpop.f32.mrf.mxu0  ;;  %743 = vmatmul.f32.gmra.mxu3 %v321_v50 }
 0x107   :  { %v486_v8 = vpop.f32.mrf.mxu3  ;;  %v540_v12 = vpop.f32.mrf.mxu2  ;;  %969 = vmatmul.f32.gmra.mxu1 %v1992_v24 }
 0x108   :  { %v541_v52 = vadd.f32 %v540_v12, %v427_v53 }
 0x10c   :  { %v910_v61 = vpop.f32.mrf.mxu1  ;;  %v817_v54 = vpop.f32.mrf.mxu0 }
 0x10f   :  { %v545_v39 = vpop.f32.mrf.mxu2  ;;  %v654_v20 = vpop.f32.mrf.mxu3 }
 0x110   :  { %v655_v7 = vadd.f32 %v654_v20, %v541_v52  ;;  %v546_v26 = vadd.f32 %v545_v39, %v431_v43 }
 0x112   :  { %v814_v10 = vadd.f32 %v813_v46, %v655_v7 }
 0x114   :  { %v911_v60 = vadd.f32 %v910_v61, %v814_v10  ;;  %v914_v50 = vpop.f32.mrf.mxu1  ;;  %v821_v24 = vpop.f32.mrf.mxu0 }
 0x116   :  { %v1069_v63 = vsub.f32 %v911_v60, %v992_v35  ;;  %v1105_v40 = vsub.f32 %v911_v60, %v1477_v42 }
 0x117   :  { %v660_v13 = vpop.f32.mrf.mxu3  ;;  %v550_v28 = vpop.f32.mrf.mxu2 }
 0x118   :  { %v661_v4 = vadd.f32 %v660_v13, %v546_v26  ;;  %v1085_v45 = vmax.f32 %v1069_v63, 0.0  ;;  %v1121_v62 = vmax.f32 %v1105_v40, 0.0 }
 0x11a   :  { %v818_v0 = vadd.f32 %v817_v54, %v661_v4  ;;  %v1137_v21 = vadd.f32 %v1121_v62, %v1085_v45 }
 0x11c   :  { %v915_v5 = vadd.f32 %v914_v50, %v818_v0  ;;  %v918_v22 = vpop.f32.mrf.mxu1  ;;  %v825_v29 = vpop.f32.mrf.mxu0  ;;  %v1281_v11 = vsel %vm1249_vm4, %v1137_v21, 0.0 }
 0x11e   :  { %v1070_v53 = vsub.f32 %v915_v5, %v997_v37  ;;  %v1106_v59 = vsub.f32 %v915_v5, %v1477_v42 }
 0x11f   :  { %v666_v2 = vpop.f32.mrf.mxu3  ;;  %v555_v49 = vpop.f32.mrf.mxu2 }
 0x120   :  { %v1086_v38 = vmax.f32 %v1070_v53, 0.0  ;;  %v1122_v41 = vmax.f32 %v1106_v59, 0.0 }
 0x122   :  { %v1138_v15 = vadd.f32 %v1122_v41, %v1086_v38 }
 0x124   :  { %v1282_v57 = vsel %vm1250_vm5, %v1138_v15, 0.0  ;;  %v922_v16 = vpop.f32.mrf.mxu1  ;;  %v829_v51 = vpop.f32.mrf.mxu0 }
 0x125   :  { %v1399_v34 = vadd.f32 %v1282_v57, %v1281_v11 }
 0x127   :  { %1414 = vadd.xlane.f32.xlu1 %v1399_v34  ;;  %v672_v44 = vpop.f32.mrf.mxu3  ;;  %v560_v48 = vpop.f32.mrf.mxu2 }
 0x12c   :  { %v926_v27 = vpop.f32.mrf.mxu1  ;;  %v833_v18 = vpop.f32.mrf.mxu0 }
 0x12f   :  { %v678_v14 = vpop.f32.mrf.mxu3  ;;  %v565_v30 = vpop.f32.mrf.mxu2 }
 0x134   :  { %v930_v33 = vpop.f32.mrf.mxu1  ;;  %v837_v19 = vpop.f32.mrf.mxu0 }
 0x137   :  { %v684_v3 = vpop.f32.mrf.mxu3  ;;  %v570_v1 = vpop.f32.mrf.mxu2 }
 0x13c   :  { %v934_v17 = vpop.f32.mrf.mxu1  ;;  %v841_v58 = vpop.f32.mrf.mxu0 }
 0x13f   :  { %v690_v25 = vpop.f32.mrf.mxu3  ;;  %v575_v9 = vpop.f32.mrf.mxu2 }
 0x144   :  { %v938_v55 = vpop.f32.mrf.mxu1  ;;  %v845_v47 = vpop.f32.mrf.mxu0 }
 0x147   :  { %v696_v36 = vpop.f32.mrf.mxu3  ;;  %v580_v46 = vpop.f32.mrf.mxu2 }
 0x14c   :  { %v942_v8 = vpop.f32.mrf.mxu1  ;;  %v849_v12 = vpop.f32.mrf.mxu0 }
 0x14f   :  { %v702_v61 = vpop.f32.mrf.mxu3  ;;  %v585_v54 = vpop.f32.mrf.mxu2 }
 0x154   :  { %v946_v52 = vpop.f32.mrf.mxu1  ;;  %v853_v39 = vpop.f32.mrf.mxu0 }
 0x157   :  { %v708_v20 = vpop.f32.mrf.mxu3  ;;  %v590_v31 = vpop.f32.mrf.mxu2 }
 0x15c   :  { %v950_v7 = vpop.f32.mrf.mxu1  ;;  %v857_v10 = vpop.f32.mrf.mxu0 }
 0x15f   :  { %v714_v35 = vpop.f32.mrf.mxu3  ;;  %v595_v43 = vpop.f32.mrf.mxu2 }
 0x164   :  { %v954_v60 = vpop.f32.mrf.mxu1  ;;  %v861_v42 = vpop.f32.mrf.mxu0 }
 0x167   :  { %v720_v50 = vpop.f32.mrf.mxu3  ;;  %v600_v56 = vpop.f32.mrf.mxu2 }
 0x16c   :  { %v958_v24 = vpop.f32.mrf.mxu1  ;;  %v865_v26 = vpop.f32.mrf.mxu0 }
 0x16f   :  { %v726_v13 = vpop.f32.mrf.mxu3  ;;  %v605_v28 = vpop.f32.mrf.mxu2 }
 0x174   :  { %v962_v63 = vpop.f32.mrf.mxu1  ;;  %v869_v40 = vpop.f32.mrf.mxu0 }
 0x177   :  { %v732_v4 = vpop.f32.mrf.mxu3  ;;  %v610_v32 = vpop.f32.mrf.mxu2 }
 0x17c   :  { %v966_v6 = vpop.f32.mrf.mxu1  ;;  %v873_v0 = vpop.f32.mrf.mxu0 }
 0x17f   :  { %v738_v23 = vpop.f32.mrf.mxu3  ;;  %v615_v45 = vpop.f32.mrf.mxu2 }
 0x184   :  { %v970_v62 = vpop.f32.mrf.mxu1 }
 0x187   :  { %v744_v5 = vpop.f32.mrf.mxu3 }
 0x19a   :  { %v1415_v22 = vpop.xlane.xlu1 %1414 }
 0x19b   :  { %v1416_v29 = vrot.slane %v1415_v22, 4 }
 0x19d   :  { %v1417_v37 = vadd.f32 %v1416_v29, %v1415_v22 }
 0x19f   :  { %v1418_v53 = vrot.slane %v1417_v37, 2 }
 0x1a1   :  { %v1419_v59 = vadd.f32 %v1418_v53, %v1417_v37 }
 0x1a3   :  { %v1420_v2 = vrot.slane %v1419_v59, 1 }
 0x1a5   :  { %v1421_v49 = vadd.f32 %v1420_v2, %v1419_v59 }
 0x1a7   :  { %1472 = vpush %v1421_v49 }
 0x1d8   :  { %s1473_s5 = spop %1472 }
 0x1d9   :  { %1424 = sst [smem:[#allocation3]] %s1473_s5 }
 0x1da   :  { %1433 = dma.smem_to_hbm %s1493_s6, 16, %s1431_s30, [#allocation4]  }
 0x1db   :  { %1490 = dma.done.wait [#allocation4], 16  }
 0x1dc   :  { %1491 = vsyncadd [#allocation4], 4294967280 }
 0x1dd   :  { %1438 = sfence }
 0x1de   :  { %1439 = vsyncpa [#allocation4], 1 }

</bundles_post_ra>
